<compile_context>
chip_gen: v7x
topology: tpu7x:2x2x1
jax: 0.10.0
libtpu: 0.0.40
codegen_flags: <defaults>
</compile_context>

<pallas_src>
import functools

import jax
import jax.numpy as jnp
from jax.experimental import pallas as pl
from jax.experimental.pallas import tpu as pltpu


def mlp_kernel(xt_ref, w1_ref, b1_ref, w2_ref, b2_ref, w3_ref, b3_ref, o_ref):
    # Feature-major layout: batch lives on the lane axis.
    xt = xt_ref[...]                                                   # (10, TB)
    h1 = jnp.dot(w1_ref[...], xt, preferred_element_type=jnp.float32)
    h1 = jnp.maximum(h1 + b1_ref[...], 0.0)                            # (100, TB)
    h2 = jnp.dot(w2_ref[...], h1, preferred_element_type=jnp.float32)
    h2 = jnp.maximum(h2 + b2_ref[...], 0.0)                            # (50, TB)
    # fc3 has out_features == 1: VPU multiply + sublane reduction instead of
    # an M=1 MXU matmul that wastes >99% of the systolic array.
    h3 = jnp.sum(h2 * w3_ref[...], axis=0, keepdims=True) + b3_ref[...]
    o_ref[...] = jnp.maximum(h3, 0.0)                                  # (1, TB)


@functools.partial(jax.jit, static_argnames=("tile_b",))
def mst_samplenet_forward(x, params, *, tile_b=512):
    """x: (n, 10) f32. params: PyTorch-layout (W (out,in), b (out,)) for 3 layers."""
    w1, b1, w2, b2, w3, b3 = params
    n, in_dim = x.shape
    h1_dim, h2_dim, out_dim = w1.shape[0], w2.shape[0], w3.shape[0]

    # Lane-aligned batch tile (multiple of 128), clamped to the batch size.
    tile_b = max(128, min(tile_b, ((n + 127) // 128) * 128))
    tile_b = ((tile_b + 127) // 128) * 128
    num_tiles = pl.cdiv(n, tile_b)
    n_pad = num_tiles * tile_b

    # Pad the batch, then go feature-major: batch -> lanes.
    xt = jnp.pad(x, ((0, n_pad - n), (0, 0))).T                 # (in_dim, n_pad)

    # Column-vector biases / fc3 weights broadcast along the lane (batch) axis.
    b1c = b1.reshape(h1_dim, 1)
    b2c = b2.reshape(h2_dim, 1)
    w3c = w3.reshape(h2_dim, 1)          # (50, 1) fc3 weight column
    b3c = b3.reshape(out_dim, 1)         # (1, 1)

    resident = lambda a: pl.BlockSpec(a.shape, lambda i: (0, 0))

    weight_bytes = 4 * (w1.size + b1.size + w2.size + b2.size + w3.size + b3.size)
    cost = pl.CostEstimate(
        flops=2 * n_pad * (in_dim * h1_dim + h1_dim * h2_dim + h2_dim * out_dim),
        transcendentals=0,
        bytes_accessed=n_pad * (in_dim + out_dim) * 4 + weight_bytes,
    )

    out = pl.pallas_call(
        mlp_kernel,
        out_shape=jax.ShapeDtypeStruct((out_dim, n_pad), jnp.float32),
        grid=(num_tiles,),
        in_specs=[
            pl.BlockSpec((in_dim, tile_b), lambda i: (0, i)),   # x^T streamed per tile
            resident(w1), resident(b1c),                        # weights VMEM-resident
            resident(w2), resident(b2c),
            resident(w3c), resident(b3c),
        ],
        out_specs=pl.BlockSpec((out_dim, tile_b), lambda i: (0, i)),  # lane-dense out
        compiler_params=pltpu.CompilerParams(
            dimension_semantics=("parallel",),   # megacore sharding on v7x
        ),
        cost_estimate=cost,
    )(xt, w1, b1c, w2, b2c, w3c, b3c)

    return out[0, :n][:, None]                                  # back to (n, 1)


def init_params(key):
    # PyTorch nn.Linear default init: U(-1/sqrt(fan_in), 1/sqrt(fan_in)),
    # weights stored (out_features, in_features), biases (out_features,).
    dims = [(10, 100), (100, 50), (50, 1)]
    params = []
    for fan_in, fan_out in dims:
        key, kw, kb = jax.random.split(key, 3)
        bound = 1.0 / jnp.sqrt(float(fan_in))
        w = jax.random.uniform(kw, (fan_out, fan_in), jnp.float32, -bound, bound)
        b = jax.random.uniform(kb, (fan_out,), jnp.float32, -bound, bound)
        params += [w, b]
    return tuple(params)


if __name__ == "__main__":
    key = jax.random.PRNGKey(0)
    key, kx = jax.random.split(key)
    # Matches the spec's x = torch.randn(100, 10).
    x = jax.random.normal(kx, (100, 10), jnp.float32)
    params = init_params(key)

    out = mst_samplenet_forward(x, params)
    jax.block_until_ready(out)

    # Plain-JAX reference (same math as the PyTorch module).
    w1, b1, w2, b2, w3, b3 = params
    ref = jnp.maximum(x @ w1.T + b1, 0.0)
    ref = jnp.maximum(ref @ w2.T + b2, 0.0)
    ref = jnp.maximum(ref @ w3.T + b3, 0.0)
    assert out.shape == (100, 1), out.shape
    assert jnp.allclose(out, ref, atol=1e-5, rtol=1e-5)

    print("KERNEL_OK")
</pallas_src>

<mosaic_0001>
module attributes {stable_mosaic.version = 11 : i64} {
  func.func @mlp_kernel(%arg0: i32, %arg1: memref<10x128xf32, #tpu.memory_space<vmem>>, %arg2: memref<100x10xf32, #tpu.memory_space<vmem>>, %arg3: memref<100x1xf32, #tpu.memory_space<vmem>>, %arg4: memref<50x100xf32, #tpu.memory_space<vmem>>, %arg5: memref<50x1xf32, #tpu.memory_space<vmem>>, %arg6: memref<50x1xf32, #tpu.memory_space<vmem>>, %arg7: memref<1x1xf32, #tpu.memory_space<vmem>>, %arg8: memref<1x128xf32, #tpu.memory_space<vmem>>) attributes {dimension_semantics = [#tpu.dimension_semantics<parallel>], iteration_bounds = array<i64: 1>, scalar_prefetch = 0 : i64, scratch_operands = 0 : i64, tpu.core_type = #tpu.core_type<tc>, window_params = [{transform_indices = @transform_0, window_bounds = array<i64: 10, 128>}, {pipeline_mode = #tpu.pipeline_mode<synchronous>, transform_indices = @transform_1, window_bounds = array<i64: 100, 10>}, {pipeline_mode = #tpu.pipeline_mode<synchronous>, transform_indices = @transform_2, window_bounds = array<i64: 100, 1>}, {pipeline_mode = #tpu.pipeline_mode<synchronous>, transform_indices = @transform_3, window_bounds = array<i64: 50, 100>}, {pipeline_mode = #tpu.pipeline_mode<synchronous>, transform_indices = @transform_4, window_bounds = array<i64: 50, 1>}, {pipeline_mode = #tpu.pipeline_mode<synchronous>, transform_indices = @transform_5, window_bounds = array<i64: 50, 1>}, {pipeline_mode = #tpu.pipeline_mode<synchronous>, transform_indices = @transform_6, window_bounds = array<i64: 1, 1>}, {transform_indices = @transform_7, window_bounds = array<i64: 1, 128>}]} {
    %c0 = arith.constant 0 : index
    %c0_0 = arith.constant 0 : index
    %0 = vector.load %arg1[%c0, %c0_0] : memref<10x128xf32, #tpu.memory_space<vmem>>, vector<10x128xf32>
    %c0_1 = arith.constant 0 : index
    %c0_2 = arith.constant 0 : index
    %1 = vector.load %arg2[%c0_1, %c0_2] : memref<100x10xf32, #tpu.memory_space<vmem>>, vector<100x10xf32>
    %cst = arith.constant dense<0.000000e+00> : vector<100x128xf32>
    %2 = tpu.matmul %1, %0, %cst {dimension_numbers = #tpu.dot_dimension_numbers<[1], [0], [0], [1], [0, 0, 1, 1], [], []>} : vector<100x10xf32>, vector<10x128xf32>, vector<100x128xf32> -> vector<100x128xf32>
    %c0_3 = arith.constant 0 : index
    %c0_4 = arith.constant 0 : index
    %3 = vector.load %arg3[%c0_3, %c0_4] : memref<100x1xf32, #tpu.memory_space<vmem>>, vector<100x1xf32>
    %4 = vector.broadcast %3 : vector<100x1xf32> to vector<100x128xf32>
    %5 = arith.addf %2, %4 : vector<100x128xf32>
    %cst_5 = arith.constant 0.000000e+00 : f32
    %6 = vector.broadcast %cst_5 : f32 to vector<100x128xf32>
    %7 = arith.maximumf %5, %6 : vector<100x128xf32>
    %c0_6 = arith.constant 0 : index
    %c0_7 = arith.constant 0 : index
    %8 = vector.load %arg4[%c0_6, %c0_7] : memref<50x100xf32, #tpu.memory_space<vmem>>, vector<50x100xf32>
    %cst_8 = arith.constant dense<0.000000e+00> : vector<50x128xf32>
    %9 = tpu.matmul %8, %7, %cst_8 {dimension_numbers = #tpu.dot_dimension_numbers<[1], [0], [0], [1], [0, 0, 1, 1], [], []>} : vector<50x100xf32>, vector<100x128xf32>, vector<50x128xf32> -> vector<50x128xf32>
    %c0_9 = arith.constant 0 : index
    %c0_10 = arith.constant 0 : index
    %10 = vector.load %arg5[%c0_9, %c0_10] : memref<50x1xf32, #tpu.memory_space<vmem>>, vector<50x1xf32>
    %11 = vector.broadcast %10 : vector<50x1xf32> to vector<50x128xf32>
    %12 = arith.addf %9, %11 : vector<50x128xf32>
    %cst_11 = arith.constant 0.000000e+00 : f32
    %13 = vector.broadcast %cst_11 : f32 to vector<50x128xf32>
    %14 = arith.maximumf %12, %13 : vector<50x128xf32>
    %c0_12 = arith.constant 0 : index
    %c0_13 = arith.constant 0 : index
    %15 = vector.load %arg6[%c0_12, %c0_13] : memref<50x1xf32, #tpu.memory_space<vmem>>, vector<50x1xf32>
    %16 = vector.broadcast %15 : vector<50x1xf32> to vector<50x128xf32>
    %17 = arith.mulf %14, %16 : vector<50x128xf32>
    %cst_14 = arith.constant dense<0.000000e+00> : vector<128xf32>
    %18 = vector.multi_reduction <add>, %17, %cst_14 [0] : vector<50x128xf32> to vector<128xf32>
    %19 = vector.shape_cast %18 : vector<128xf32> to vector<1x128xf32>
    %c0_15 = arith.constant 0 : index
    %c0_16 = arith.constant 0 : index
    %20 = vector.load %arg7[%c0_15, %c0_16] : memref<1x1xf32, #tpu.memory_space<vmem>>, vector<1x1xf32>
    %21 = vector.broadcast %20 : vector<1x1xf32> to vector<1x128xf32>
    %22 = arith.addf %19, %21 : vector<1x128xf32>
    %cst_17 = arith.constant 0.000000e+00 : f32
    %23 = vector.broadcast %cst_17 : f32 to vector<1x128xf32>
    %24 = arith.maximumf %22, %23 : vector<1x128xf32>
    %c0_18 = arith.constant 0 : index
    %c0_19 = arith.constant 0 : index
    %25 = vector.load %arg8[%c0_18, %c0_19] : memref<1x128xf32, #tpu.memory_space<vmem>>, vector<1x128xf32>
    tpu.vector_store %arg8[%c0_18, %c0_19], %24 {strides = array<i32>} : memref<1x128xf32, #tpu.memory_space<vmem>>, vector<1x128xf32>,
    return
  }
  func.func @transform_0(%arg0: i32) -> (i32, i32) {
    %c0_i32 = arith.constant 0 : i32
    %c0_i32_0 = arith.constant 0 : i32
    return %c0_i32, %arg0 : i32, i32
  }
  func.func @transform_1(%arg0: i32) -> (i32, i32) {
    %c0_i32 = arith.constant 0 : i32
    %c0_i32_0 = arith.constant 0 : i32
    %c0_i32_1 = arith.constant 0 : i32
    return %c0_i32, %c0_i32_0 : i32, i32
  }
  func.func @transform_2(%arg0: i32) -> (i32, i32) {
    %c0_i32 = arith.constant 0 : i32
    %c0_i32_0 = arith.constant 0 : i32
    %c0_i32_1 = arith.constant 0 : i32
    return %c0_i32, %c0_i32_0 : i32, i32
  }
  func.func @transform_3(%arg0: i32) -> (i32, i32) {
    %c0_i32 = arith.constant 0 : i32
    %c0_i32_0 = arith.constant 0 : i32
    %c0_i32_1 = arith.constant 0 : i32
    return %c0_i32, %c0_i32_0 : i32, i32
  }
  func.func @transform_4(%arg0: i32) -> (i32, i32) {
    %c0_i32 = arith.constant 0 : i32
    %c0_i32_0 = arith.constant 0 : i32
    %c0_i32_1 = arith.constant 0 : i32
    return %c0_i32, %c0_i32_0 : i32, i32
  }
  func.func @transform_5(%arg0: i32) -> (i32, i32) {
    %c0_i32 = arith.constant 0 : i32
    %c0_i32_0 = arith.constant 0 : i32
    %c0_i32_1 = arith.constant 0 : i32
    return %c0_i32, %c0_i32_0 : i32, i32
  }
  func.func @transform_6(%arg0: i32) -> (i32, i32) {
    %c0_i32 = arith.constant 0 : i32
    %c0_i32_0 = arith.constant 0 : i32
    %c0_i32_1 = arith.constant 0 : i32
    return %c0_i32, %c0_i32_0 : i32, i32
  }
  func.func @transform_7(%arg0: i32) -> (i32, i32) {
    %c0_i32 = arith.constant 0 : i32
    %c0_i32_0 = arith.constant 0 : i32
    return %c0_i32, %arg0 : i32, i32
  }
}

</mosaic_0001>

<bundles_post_ra>
// kernel: mst_samplenet_forward.1
= control target key start
LH: loop header
LB: loop body
LE: loop exit
PB: predicated region body
PF: predicated region fallthrough
CT: control target
= control target key end

     0   :  { %vm161_vm0 = vcmask 1041408   ;;  %v745_v0 = vmov 0.0|0.0   ;;  %vm746_vm1 = vmmov 1   ;;  %vm747_vm3 = vmmov 0   ;;  %s1013_s0 = inlined_call_operand.vmem [shape: f32[10,128], index: 0, kind: input, shape index: {}]   ;;  %s1014_s6 = inlined_call_operand.<no memory space> [shape: f32[1,1], index: 6, kind: input, shape index: {}]   ;;  %s1015_s1 = inlined_call_operand.vmem [shape: f32[100,10], index: 1, kind: input, shape index: {}]   ;;  %s1016_s2 = inlined_call_operand.vmem [shape: f32[100,1], index: 2, kind: input, shape index: {}]   ;;  %s1017_s4 = inlined_call_operand.vmem [shape: f32[50,1], index: 4, kind: input, shape index: {}]   ;;  %s1018_s5 = inlined_call_operand.vmem [shape: f32[50,1], index: 5, kind: input, shape index: {}]   ;;  %s1019_s3 = inlined_call_operand.vmem [shape: f32[50,100], index: 3, kind: input, shape index: {}]   ;;  %s1020_s7 = inlined_call_operand.vmem [shape: f32[1,128], index: 7, kind: output, shape index: {}]  }
   0x1   :  { %716 = vmatprep.subr.bf16.mxu0 %v745_v0  ;;  %v28_v1 = vld [vmem:[%s1013_s0] sm:$0xff]  ;;  %v29_v2 = vld [vmem:[%s1013_s0 + $0x8] sm:$0x3]  ;;  %vm718_vm2 = vmpackc.low %vm161_vm0, %vm746_vm1  ;;  %v12_v3 = vstv %s1014_s6  ;;  %720 = vmatprep.subr.bf16.mxu1 %v745_v0  ;;  %v748_v5 = vmov 0.0   ;;  %v749_v6 = vmov 0   ;;  %vm121_vm4 = vcmask 80896  }
   0x2   :  { %v717_v4 = vpack.c.bf16 %v29_v2, %v28_v1  ;;  %630 = vmatprep.mubr.msk.f32.mxu0 %vm747_vm3, %v748_v5  ;;  %743 = vset.pattern.permute.xlu0 %v749_v6  ;;  %13 = vst [vmem:[#allocation2] sm:$0x1] %v12_v3  ;;  %v30_v7 = vld [vmem:[%s1015_s1] sm:$0xff]  ;;  %v45_v9 = vld [vmem:[%s1016_s2 + $0x10] sm:$0xff]  ;;  %v31_v10 = vld [vmem:[%s1015_s1 + $0x8] sm:$0xff]  ;;  %vm379_vm5 = vcmask 1043456  }
   0x3   :  { %744 = vset.pattern.permute.xlu1 %v749_v6  ;;  %695 = vmatprep.mubr.msk.f32.mxu1 %vm747_vm3, %v748_v5  ;;  %v43_v8 = vld [vmem:[%s1016_s2] sm:$0xff]  ;;  %v44_v11 = vld [vmem:[%s1016_s2 + $0x8] sm:$0xff]  ;;  %v46_v12 = vld [vmem:[%s1016_s2 + $0x18] sm:$0xff]  ;;  %vm357_vm6 = vcmask 818176  }
   0x4   :  { %719 = vmatpush3.bf16.msk.msra.mxu0 %vm718_vm2, %v717_v4  ;;  %58 = vperm.xlu0 %743, %v43_v8   ;;  %v32_v13 = vld [vmem:[%s1015_s1 + $0x10] sm:$0xff]  ;;  %v47_v14 = vld [vmem:[%s1016_s2 + $0x20] sm:$0xff]  ;;  %v48_v15 = vld [vmem:[%s1016_s2 + $0x28] sm:$0xff] }
   0x5   :  { %68 = vperm.xlu1 %744, %v45_v9   ;;  %v33_v16 = vld [vmem:[%s1015_s1 + $0x18] sm:$0xff]  ;;  %v49_v17 = vld [vmem:[%s1016_s2 + $0x30] sm:$0xff]  ;;  %v34_v19 = vld [vmem:[%s1015_s1 + $0x20] sm:$0xff] }
   0x6   :  { %v50_v18 = vld [vmem:[%s1016_s2 + $0x38] sm:$0xff]  ;;  %v51_v20 = vld [vmem:[%s1016_s2 + $0x40] sm:$0xff]  ;;  %v52_v21 = vld [vmem:[%s1016_s2 + $0x48] sm:$0xff] }
   0x7   :  { %631 = vmatmul.mubr.msk.f32.vlgmr.msra.gmra.mrb[0].mxu0 %vm121_vm4, %v30_v7  ;;  %v35_v22 = vld [vmem:[%s1015_s1 + $0x28] sm:$0xff]  ;;  %v53_v23 = vld [vmem:[%s1016_s2 + $0x50] sm:$0xff]  ;;  %v54_v24 = vld [vmem:[%s1016_s2 + $0x58] sm:$0xff] }
   0x8   :  { %633 = vmatprep.mubr.msk.f32.mxu0 %vm747_vm3, %v748_v5  ;;  %63 = vperm.xlu0 %743, %v44_v11   ;;  %v36_v25 = vld [vmem:[%s1015_s1 + $0x30] sm:$0xff]  ;;  %v55_v26 = vld [vmem:[%s1016_s2 + $0x60] sm:$0xf]  ;;  %v37_v28 = vld [vmem:[%s1015_s1 + $0x38] sm:$0xff] }
   0x9   :  { %73 = vperm.xlu1 %744, %v46_v12   ;;  %v315_v27 = vld [vmem:[%s1017_s4] sm:$0xff]  ;;  %v316_v29 = vld [vmem:[%s1017_s4 + $0x8] sm:$0xff]  ;;  %v317_v30 = vld [vmem:[%s1017_s4 + $0x10] sm:$0xff] }
   0xa   :  { %v38_v31 = vld [vmem:[%s1015_s1 + $0x40] sm:$0xff]  ;;  %v318_v32 = vld [vmem:[%s1017_s4 + $0x18] sm:$0xff]  ;;  %v39_v34 = vld [vmem:[%s1015_s1 + $0x48] sm:$0xff] }
   0xb   :  { %634 = vmatmul.mubr.msk.f32.gmra.mrb[2].mxu0 %vm121_vm4, %v31_v10  ;;  %v490_v33 = vld [vmem:[%s1018_s5] sm:$0xff]  ;;  %v491_v35 = vld [vmem:[%s1018_s5 + $0x8] sm:$0xff]  ;;  %v40_v37 = vld [vmem:[%s1015_s1 + $0x50] sm:$0xff] }
   0xc   :  { %636 = vmatprep.mubr.msk.f32.mxu0 %vm747_vm3, %v748_v5  ;;  %78 = vperm.xlu0 %743, %v47_v14   ;;  %v319_v36 = vld [vmem:[%s1017_s4 + $0x20] sm:$0xff]  ;;  %v492_v38 = vld [vmem:[%s1018_s5 + $0x10] sm:$0xff]  ;;  %v320_v39 = vld [vmem:[%s1017_s4 + $0x28] sm:$0xff] }
   0xd   :  { %83 = vperm.xlu1 %744, %v48_v15   ;;  %v41_v40 = vld [vmem:[%s1015_s1 + $0x58] sm:$0xff]  ;;  %v321_v42 = vld [vmem:[%s1017_s4 + $0x30] sm:$0x3]  ;;  %v42_v43 = vld [vmem:[%s1015_s1 + $0x60] sm:$0xf] }
   0xe   :  { %v493_v41 = vld [vmem:[%s1018_s5 + $0x18] sm:$0xff]  ;;  %v494_v44 = vld [vmem:[%s1018_s5 + $0x20] sm:$0xff]  ;;  %v495_v45 = vld [vmem:[%s1018_s5 + $0x28] sm:$0xff] }
   0xf   :  { %637 = vmatmul.mubr.msk.f32.gmra.mrb[4].mxu0 %vm121_vm4, %v32_v13  ;;  %v496_v46 = vld [vmem:[%s1018_s5 + $0x30] sm:$0x3]  ;;  %v552_v47 = vld [vmem:[#allocation2] sm:$0x1] }
  0x10   :  { %639 = vmatprep.mubr.msk.f32.mxu0 %vm747_vm3, %v748_v5  ;;  %88 = vperm.xlu0 %743, %v49_v17  }
  0x11   :  { %93 = vperm.xlu1 %744, %v50_v18  }
  0x13   :  { %640 = vmatmul.mubr.msk.f32.gmra.mrb[6].mxu0 %vm121_vm4, %v33_v16 }
  0x14   :  { %642 = vmatprep.mubr.msk.f32.mxu0 %vm747_vm3, %v748_v5  ;;  %98 = vperm.xlu0 %743, %v51_v20  }
  0x15   :  { %103 = vperm.xlu1 %744, %v52_v21  }
  0x17   :  { %643 = vmatmul.mubr.msk.f32.gmra.mrb[8].mxu0 %vm121_vm4, %v34_v19 }
  0x18   :  { %645 = vmatprep.mubr.msk.f32.mxu0 %vm747_vm3, %v748_v5  ;;  %108 = vperm.xlu0 %743, %v53_v23  }
  0x19   :  { %113 = vperm.xlu1 %744, %v54_v24  }
  0x1b   :  { %646 = vmatmul.mubr.msk.f32.gmra.mrb[10].mxu0 %vm121_vm4, %v35_v22 }
  0x1c   :  { %648 = vmatprep.mubr.msk.f32.mxu0 %vm747_vm3, %v748_v5  ;;  %118 = vperm.xlu0 %743, %v55_v26  }
  0x1d   :  { %324 = vperm.xlu1 %744, %v315_v27  }
  0x1f   :  { %649 = vmatmul.mubr.msk.f32.gmra.mrb[12].mxu0 %vm121_vm4, %v36_v25 }
  0x20   :  { %651 = vmatprep.mubr.msk.f32.mxu0 %vm747_vm3, %v748_v5  ;;  %329 = vperm.xlu0 %743, %v316_v29  }
  0x21   :  { %334 = vperm.xlu1 %744, %v317_v30  }
  0x23   :  { %652 = vmatmul.mubr.msk.f32.gmra.mrb[14].mxu0 %vm121_vm4, %v37_v28 }
  0x24   :  { %654 = vmatprep.mubr.msk.f32.mxu0 %vm747_vm3, %v748_v5  ;;  %339 = vperm.xlu0 %743, %v318_v32  }
  0x25   :  { %499 = vperm.xlu1 %744, %v490_v33  }
  0x27   :  { %655 = vmatmul.mubr.msk.f32.gmra.mrb[16].mxu0 %vm121_vm4, %v38_v31 }
  0x28   :  { %657 = vmatprep.mubr.msk.f32.mxu0 %vm747_vm3, %v748_v5  ;;  %504 = vperm.xlu0 %743, %v491_v35  }
  0x29   :  { %344 = vperm.xlu1 %744, %v319_v36  }
  0x2b   :  { %658 = vmatmul.mubr.msk.f32.gmra.mrb[18].mxu0 %vm121_vm4, %v39_v34 }
  0x2c   :  { %660 = vmatprep.mubr.msk.f32.mxu0 %vm747_vm3, %v748_v5  ;;  %509 = vperm.xlu0 %743, %v492_v38  }
  0x2d   :  { %349 = vperm.xlu1 %744, %v320_v39  }
  0x2f   :  { %661 = vmatmul.mubr.msk.f32.gmra.mrb[20].mxu0 %vm121_vm4, %v40_v37 }
  0x30   :  { %663 = vmatprep.mubr.msk.f32.mxu0 %vm747_vm3, %v748_v5  ;;  %514 = vperm.xlu0 %743, %v493_v41  }
  0x31   :  { %354 = vperm.xlu1 %744, %v321_v42  }
  0x33   :  { %664 = vmatmul.mubr.msk.f32.gmra.mrb[22].mxu0 %vm121_vm4, %v41_v40 }
  0x34   :  { %666 = vmatprep.mubr.msk.f32.mxu0 %vm747_vm3, %v748_v5  ;;  %519 = vperm.xlu0 %743, %v494_v44  }
  0x35   :  { %524 = vperm.xlu1 %744, %v495_v45  }
  0x37   :  { %667 = vmatmul.mubr.msk.f32.gmra.mrb[24].mxu0 %vm121_vm4, %v42_v43 }
  0x38   :  { %529 = vperm.xlu0 %743, %v496_v46  }
  0x39   :  { %555 = vperm.xlu1 %744, %v552_v47  }
  0x83   :  { %v59_v48 = vpop.permute.xlu0 %58 }
  0x84   :  { %v69_v56 = vpop.permute.xlu1 %68 }
  0x87   :  { %v64_v52 = vpop.permute.xlu0 %63 }
  0x88   :  { %v74_v63 = vpop.permute.xlu1 %73 }
  0x8b   :  { %v79_v10 = vpop.permute.xlu0 %78 }
  0x8c   :  { %v84_v12 = vpop.permute.xlu1 %83 }
  0x8f   :  { %v89_v21 = vpop.permute.xlu0 %88 }
  0x90   :  { %v94_v23 = vpop.permute.xlu1 %93 }
  0x93   :  { %v99_v32 = vpop.permute.xlu0 %98 }
  0x94   :  { %v104_v34 = vpop.permute.xlu1 %103 }
  0x97   :  { %v109_v43 = vpop.permute.xlu0 %108 }
  0x98   :  { %v114_v45 = vpop.permute.xlu1 %113 }
  0xda   :  { %v231_v49 = vpop.f32.mrb[0].mxu0 }
  0xdb   :  { %v632_v50 = vpop.f32.mrb[1].mxu0  ;;  %v232_v51 = vadd.f32 %v231_v49, %v59_v48 }
  0xdd   :  { %v295_v57 = vmax.f32 %v232_v51, 0.0  ;;  %v119_v51 = vpop.permute.xlu0 %118 }
  0xde   :  { %v236_v53 = vpop.f32.mrb[2].mxu0 }
  0xdf   :  { %v237_v54 = vadd.f32 %v236_v53, %v64_v52  ;;  %v635_v55 = vpop.f32.mrb[3].mxu0 }
  0xe1   :  { %v296_v58 = vmax.f32 %v237_v54, 0.0 }
  0xe2   :  { %v241_v59 = vpop.f32.mrb[4].mxu0 }
  0xe3   :  { %v638_v60 = vpop.f32.mrb[5].mxu0  ;;  %v721_v61 = vpack.c.bf16 %v296_v58, %v295_v57  ;;  %v242_v62 = vadd.f32 %v241_v59, %v69_v56  ;;  %v308_v57 = vld [vmem:[%s1019_s3] sm:$0xff]  ;;  %v310_v58 = vld [vmem:[%s1019_s3 + $0x10] sm:$0xff]  ;;  %v311_v59 = vld [vmem:[%s1019_s3 + $0x18] sm:$0xff] }
  0xe4   :  { %v312_v60 = vld [vmem:[%s1019_s3 + $0x20] sm:$0xff] }
  0xe5   :  { %722 = vmatpush3.bf16.msra.mxu1 %v721_v61  ;;  %v297_v4 = vmax.f32 %v242_v62, 0.0  ;;  %v313_v61 = vld [vmem:[%s1019_s3 + $0x28] sm:$0xff]  ;;  %v314_v62 = vld [vmem:[%s1019_s3 + $0x30] sm:$0x3] }
  0xe6   :  { %v246_v1 = vpop.f32.mrb[6].mxu0  ;;  %723 = vmatprep.subr.bf16.mxu1 %v745_v0 }
  0xe7   :  { %v247_v2 = vadd.f32 %v246_v1, %v74_v63  ;;  %v641_v3 = vpop.f32.mrb[7].mxu0  ;;  %v325_v63 = vpop.permute.xlu1 %324 }
  0xe8   :  { %v330_v1 = vpop.permute.xlu0 %329 }
  0xe9   :  { %v298_v6 = vmax.f32 %v247_v2, 0.0 }
  0xea   :  { %v251_v7 = vpop.f32.mrb[8].mxu0 }
  0xeb   :  { %v724_v8 = vpack.c.bf16 %v298_v6, %v297_v4  ;;  %v644_v9 = vpop.f32.mrb[9].mxu0  ;;  %v252_v11 = vadd.f32 %v251_v7, %v79_v10  ;;  %v335_v2 = vpop.permute.xlu1 %334 }
  0xec   :  { %v340_v3 = vpop.permute.xlu0 %339 }
  0xed   :  { %725 = vmatpush3.bf16.msra.mxu1 %v724_v8  ;;  %v299_v16 = vmax.f32 %v252_v11, 0.0 }
  0xee   :  { %v256_v13 = vpop.f32.mrb[10].mxu0  ;;  %726 = vmatprep.subr.bf16.mxu1 %v745_v0 }
  0xef   :  { %v257_v14 = vadd.f32 %v256_v13, %v84_v12  ;;  %v647_v15 = vpop.f32.mrb[11].mxu0  ;;  %v500_v4 = vpop.permute.xlu1 %499 }
  0xf0   :  { %v505_v9 = vpop.permute.xlu0 %504 }
  0xf1   :  { %v300_v17 = vmax.f32 %v257_v14, 0.0 }
  0xf2   :  { %v261_v18 = vpop.f32.mrb[12].mxu0 }
  0xf3   :  { %v727_v19 = vpack.c.bf16 %v300_v17, %v299_v16  ;;  %v650_v20 = vpop.f32.mrb[13].mxu0  ;;  %v262_v22 = vadd.f32 %v261_v18, %v89_v21 }
  0xf4   :  { %v510_v15 = vpop.permute.xlu0 %509 }
  0xf5   :  { %728 = vmatpush3.bf16.msra.mxu1 %v727_v19  ;;  %v301_v27 = vmax.f32 %v262_v22, 0.0 }
  0xf6   :  { %v266_v24 = vpop.f32.mrb[14].mxu0  ;;  %729 = vmatprep.subr.bf16.mxu1 %v745_v0 }
  0xf7   :  { %v267_v25 = vadd.f32 %v266_v24, %v94_v23  ;;  %v653_v26 = vpop.f32.mrb[15].mxu0 }
  0xf9   :  { %v302_v28 = vmax.f32 %v267_v25, 0.0 }
  0xfa   :  { %v271_v29 = vpop.f32.mrb[16].mxu0 }
  0xfb   :  { %v730_v30 = vpack.c.bf16 %v302_v28, %v301_v27  ;;  %v656_v31 = vpop.f32.mrb[17].mxu0  ;;  %v272_v33 = vadd.f32 %v271_v29, %v99_v32  ;;  %v515_v28 = vpop.permute.xlu0 %514 }
  0xfd   :  { %731 = vmatpush3.bf16.msra.mxu1 %v730_v30  ;;  %v303_v38 = vmax.f32 %v272_v33, 0.0 }
  0xfe   :  { %v276_v35 = vpop.f32.mrb[18].mxu0  ;;  %732 = vmatprep.subr.bf16.mxu1 %v745_v0 }
  0xff   :  { %v277_v36 = vadd.f32 %v276_v35, %v104_v34  ;;  %v659_v37 = vpop.f32.mrb[19].mxu0 }
 0x101   :  { %v304_v39 = vmax.f32 %v277_v36, 0.0 }
 0x102   :  { %v281_v40 = vpop.f32.mrb[20].mxu0 }
 0x103   :  { %v733_v41 = vpack.c.bf16 %v304_v39, %v303_v38  ;;  %v662_v42 = vpop.f32.mrb[21].mxu0  ;;  %v282_v44 = vadd.f32 %v281_v40, %v109_v43  ;;  %v520_v38 = vpop.permute.xlu0 %519 }
 0x105   :  { %734 = vmatpush3.bf16.msra.mxu1 %v733_v41  ;;  %v305_v49 = vmax.f32 %v282_v44, 0.0 }
 0x106   :  { %v286_v46 = vpop.f32.mrb[22].mxu0  ;;  %735 = vmatprep.subr.bf16.mxu1 %v745_v0  ;;  %v309_v0 = vld [vmem:[%s1019_s3 + $0x8] sm:$0xff] }
 0x107   :  { %v287_v47 = vadd.f32 %v286_v46, %v114_v45  ;;  %v665_v48 = vpop.f32.mrb[23].mxu0 }
 0x109   :  { %v306_v50 = vmax.f32 %v287_v47, 0.0 }
 0x10a   :  { %v291_v52 = vpop.f32.mrb[24].mxu0 }
 0x10b   :  { %v736_v53 = vpack.c.bf16 %v306_v50, %v305_v49  ;;  %v292_v54 = vadd.f32 %v291_v52, %v119_v51  ;;  %v668_v55 = vpop.f32.mrb[25].mxu0  ;;  %v530_v52 = vpop.permute.xlu0 %529 }
 0x10c   :  { %v558_v55 = vlaneseq }
 0x10d   :  { %737 = vmatpush3.bf16.msra.mxu1 %v736_v53  ;;  %v307_v56 = vmax.f32 %v292_v54, 0.0 }
 0x10e   :  { %693 = vmatprep.subr.mxu1 %v748_v5 }
 0x111   :  { %694 = vmatpush3.msk.msra.mxu1 %vm379_vm5, %v307_v56 }
 0x112   :  { %696 = vmatmul.mubr.msk.f32.vlgmr.msra.gmra.mrb[0].mxu1 %vm357_vm6, %v308_v57 }
 0x113   :  { %698 = vmatprep.mubr.msk.f32.mxu1 %vm747_vm3, %v748_v5 }
 0x116   :  { %699 = vmatmul.mubr.msk.f32.gmra.mrb[2].mxu1 %vm357_vm6, %v309_v0  ;;  %v559_v0 = vshrl.u32 %v558_v55, 7 }
 0x117   :  { %701 = vmatprep.mubr.msk.f32.mxu1 %vm747_vm3, %v748_v5 }
 0x11a   :  { %702 = vmatmul.mubr.msk.f32.gmra.mrb[4].mxu1 %vm357_vm6, %v310_v58 }
 0x11b   :  { %704 = vmatprep.mubr.msk.f32.mxu1 %vm747_vm3, %v748_v5 }
 0x11e   :  { %705 = vmatmul.mubr.msk.f32.gmra.mrb[6].mxu1 %vm357_vm6, %v311_v59 }
 0x11f   :  { %707 = vmatprep.mubr.msk.f32.mxu1 %vm747_vm3, %v748_v5 }
 0x122   :  { %708 = vmatmul.mubr.msk.f32.gmra.mrb[8].mxu1 %vm357_vm6, %v312_v60  ;;  %v560_v60 = vsub.s32 0, %v559_v0 }
 0x123   :  { %710 = vmatprep.mubr.msk.f32.mxu1 %vm747_vm3, %v748_v5 }
 0x126   :  { %711 = vmatmul.mubr.msk.f32.gmra.mrb[10].mxu1 %vm357_vm6, %v313_v61 }
 0x127   :  { %713 = vmatprep.mubr.msk.f32.mxu1 %vm747_vm3, %v748_v5  ;;  %v345_v5 = vpop.permute.xlu1 %344 }
 0x12a   :  { %714 = vmatmul.mubr.msk.f32.gmra.mrb[12].mxu1 %vm357_vm6, %v314_v62 }
 0x12b   :  { %v350_v23 = vpop.permute.xlu1 %349 }
 0x12f   :  { %v355_v35 = vpop.permute.xlu1 %354 }
 0x133   :  { %v525_v45 = vpop.permute.xlu1 %524 }
 0x137   :  { %v556_v62 = vpop.permute.xlu1 %555 }
 0x1e5   :  { %v449_v6 = vpop.f32.mrb[0].mxu1 }
 0x1e6   :  { %v450_v7 = vadd.f32 %v449_v6, %v325_v63  ;;  %v697_v8 = vpop.f32.mrb[1].mxu1 }
 0x1e8   :  { %v483_v11 = vmax.f32 %v450_v7, 0.0 }
 0x1e9   :  { %v454_v10 = vpop.f32.mrb[2].mxu1 }
 0x1ea   :  { %v455_v12 = vadd.f32 %v454_v10, %v330_v1  ;;  %v700_v13 = vpop.f32.mrb[3].mxu1  ;;  %v532_v17 = vmul.f32 %v500_v4, %v483_v11  ;;  %v561_v1 = vrot.slane %v556_v62, %v560_v60 }
 0x1ec   :  { %v484_v14 = vmax.f32 %v455_v12, 0.0 }
 0x1ed   :  { %v459_v16 = vpop.f32.mrb[4].mxu1 }
 0x1ee   :  { %v533_v18 = vmul.f32 %v505_v9, %v484_v14  ;;  %v460_v19 = vadd.f32 %v459_v16, %v335_v2  ;;  %v703_v20 = vpop.f32.mrb[5].mxu1 }
 0x1f0   :  { %v539_v21 = vadd.f32 %v533_v18, %v532_v17  ;;  %v485_v22 = vmax.f32 %v460_v19, 0.0 }
 0x1f1   :  { %v464_v24 = vpop.f32.mrb[6].mxu1 }
 0x1f2   :  { %v534_v25 = vmul.f32 %v510_v15, %v485_v22  ;;  %v465_v26 = vadd.f32 %v464_v24, %v340_v3  ;;  %v706_v27 = vpop.f32.mrb[7].mxu1 }
 0x1f4   :  { %v540_v29 = vadd.f32 %v539_v21, %v534_v25  ;;  %v486_v30 = vmax.f32 %v465_v26, 0.0 }
 0x1f5   :  { %v469_v31 = vpop.f32.mrb[8].mxu1 }
 0x1f6   :  { %v535_v32 = vmul.f32 %v515_v28, %v486_v30  ;;  %v470_v33 = vadd.f32 %v469_v31, %v345_v5  ;;  %v709_v34 = vpop.f32.mrb[9].mxu1 }
 0x1f8   :  { %v541_v36 = vadd.f32 %v540_v29, %v535_v32  ;;  %v487_v37 = vmax.f32 %v470_v33, 0.0 }
 0x1f9   :  { %v474_v39 = vpop.f32.mrb[10].mxu1 }
 0x1fa   :  { %v536_v40 = vmul.f32 %v520_v38, %v487_v37  ;;  %v475_v41 = vadd.f32 %v474_v39, %v350_v23  ;;  %v712_v42 = vpop.f32.mrb[11].mxu1 }
 0x1fc   :  { %v542_v43 = vadd.f32 %v541_v36, %v536_v40  ;;  %v488_v44 = vmax.f32 %v475_v41, 0.0 }
 0x1fd   :  { %v479_v46 = vpop.f32.mrb[12].mxu1 }
 0x1fe   :  { %v537_v47 = vmul.f32 %v525_v45, %v488_v44  ;;  %v480_v48 = vadd.f32 %v479_v46, %v355_v35  ;;  %v715_v49 = vpop.f32.mrb[13].mxu1 }
 0x200   :  { %v543_v50 = vadd.f32 %v542_v43, %v537_v47  ;;  %v489_v51 = vmax.f32 %v480_v48, 0.0 }
 0x202   :  { %v538_v53 = vmul.f32 %v530_v52, %v489_v51 }
 0x204   :  { %v544_v54 = vsel %vm161_vm0, %v538_v53, 0.0 }
 0x205   :  { %v545_v56 = vadd.f32 %v544_v54, %v543_v50 }
 0x207   :  { %v546_v57 = vrot.slane %v545_v56, 4 }
 0x209   :  { %v547_v58 = vadd.f32 %v546_v57, %v545_v56 }
 0x20b   :  { %v548_v59 = vrot.slane %v547_v58, 2 }
 0x20d   :  { %v549_v61 = vadd.f32 %v548_v59, %v547_v58 }
 0x20f   :  { %v550_v63 = vrot.slane %v549_v61, 1 }
 0x211   :  { %v551_v2 = vadd.f32 %v550_v63, %v549_v61 }
 0x213   :  { %v562_v3 = vadd.f32 %v561_v1, %v551_v2 }
 0x215   :  { %v563_v4 = vmax.f32 %v562_v3, 0.0 }
 0x217   :  { %564 = vst [vmem:[%s1020_s7] sm:$0x1] %v563_v4 }

</bundles_post_ra>
